<compile_context>
chip_gen: v7x
topology: tpu7x:2x2x1
jax: 0.10.0
libtpu: 0.0.40
codegen_flags: <defaults>
</compile_context>

<pallas_src>
import functools

import jax
import jax.numpy as jnp
from jax.experimental import pallas as pl
from jax.experimental.pallas import tpu as pltpu


def _round_up(x, m):
    return ((x + m - 1) // m) * m


def _gated_conv_kernel(p_ref, wo_ref, wg_ref, bo_ref, bg_ref, o_ref):
    # p_ref : (K, MT)     bf16 im2col patch tile; lanes = flattened (n, oh, ow)
    # wo_ref: (Cout, K)   bf16 "out"  half of the conv weight (resident)
    # wg_ref: (Cout, K)   bf16 "gate" half of the conv weight (resident)
    # bo_ref: (Cout, 1)   f32 bias (out half)
    # bg_ref: (Cout, 1)   f32 bias (gate half)
    # o_ref : (Cout, MT)  lane-dense output tile
    p = p_ref[...]
    out = jnp.dot(wo_ref[...], p, preferred_element_type=jnp.float32) + bo_ref[...]
    gate = jnp.dot(wg_ref[...], p, preferred_element_type=jnp.float32) + bg_ref[...]
    # Gating math stays in f32 (bounded bf16 error; v5e has no bf16 VPU/EUP).
    o_ref[...] = (out * jax.nn.sigmoid(gate)).astype(o_ref.dtype)


def gated_conv2d(x_nchw, weight_oihw, bias, *, stride=1, padding=0, m_tile=1024):
    """GatedConv2d forward.

    x_nchw: (N, Cin, H, W); weight_oihw: (2*Cout, Cin, KH, KW); bias: (2*Cout,).
    """
    N, Cin, H, W = x_nchw.shape
    C2, Cin_w, KH, KW = weight_oihw.shape
    assert Cin_w == Cin and C2 % 2 == 0
    Cout = C2 // 2

    Hp, Wp = H + 2 * padding, W + 2 * padding
    Ho = (Hp - KH) // stride + 1
    Wo = (Wp - KW) // stride + 1
    K = KH * KW * Cin
    NM = N * Ho * Wo

    # Lane tile: multiple of 128, never larger than the (128-rounded) problem.
    assert m_tile % 128 == 0, "m_tile must be a multiple of 128"
    m_tile = min(m_tile, _round_up(NM, 128))
    NM_pad = _round_up(NM, m_tile)
    num_tiles = NM_pad // m_tile

    # ---- wrapper-side glue (plain XLA): pad + im2col + weight split ----
    x_pad = jnp.pad(x_nchw, ((0, 0), (0, 0), (padding, padding), (padding, padding)))
    taps = []
    for kh in range(KH):
        for kw in range(KW):
            taps.append(x_pad[:, :, kh::stride, kw::stride][:, :, :Ho, :Wo])
    # (N, KH*KW, Cin, Ho, Wo) -> (KH*KW, Cin, N, Ho, Wo) -> (K, N*Ho*Wo)
    # sublane k = (kh*KW + kw)*Cin + c ; lane = n*Ho*Wo + oh*Wo + ow
    patches = jnp.stack(taps, axis=1).transpose(1, 2, 0, 3, 4).reshape(K, NM)
    if NM_pad > NM:
        patches = jnp.pad(patches, ((0, 0), (0, NM_pad - NM)))
    patches = patches.astype(jnp.bfloat16)

    # OIHW -> (2*Cout, KH, KW, Cin) -> (2*Cout, K): same k ordering as patches.
    w2d = jnp.transpose(weight_oihw, (0, 2, 3, 1)).reshape(C2, K)
    # torch.chunk order: out half first, gate half second.
    w_out = w2d[:Cout].astype(jnp.bfloat16)
    w_gate = w2d[Cout:].astype(jnp.bfloat16)
    b_out = bias[:Cout].reshape(Cout, 1).astype(jnp.float32)
    b_gate = bias[Cout:].reshape(Cout, 1).astype(jnp.float32)

    # Explicit VMEM budget: double-buffered patch + output tiles, resident
    # bf16 weights, headroom.  Bounded by m_tile, so it fits the 16 MiB (v5e)
    # scoped default and v7x's 64 MiB physical VMEM.
    est = (2 * K * m_tile * 2            # patch tile, bf16, double-buffered
           + 2 * 2 * Cout * K * 2        # w_out + w_gate, bf16
           + 2 * 2 * Cout * 4            # biases
           + 2 * Cout * m_tile * 4)      # output tile, f32, double-buffered
    vmem_bytes = int(min(48 << 20, max(3 * est, 16 << 20)))

    out = pl.pallas_call(
        _gated_conv_kernel,
        out_shape=jax.ShapeDtypeStruct((Cout, NM_pad), x_nchw.dtype),
        grid_spec=pltpu.PrefetchScalarGridSpec(
            num_scalar_prefetch=0,
            grid=(num_tiles,),
            in_specs=[
                pl.BlockSpec((K, m_tile), lambda i: (0, i)),
                pl.BlockSpec((Cout, K), lambda i: (0, 0)),
                pl.BlockSpec((Cout, K), lambda i: (0, 0)),
                pl.BlockSpec((Cout, 1), lambda i: (0, 0)),
                pl.BlockSpec((Cout, 1), lambda i: (0, 0)),
            ],
            out_specs=pl.BlockSpec((Cout, m_tile), lambda i: (0, i)),
        ),
        compiler_params=pltpu.CompilerParams(
            dimension_semantics=("parallel",),
            vmem_limit_bytes=vmem_bytes,
        ),
    )(patches, w_out, w_gate, b_out, b_gate)

    # (Cout, N*Ho*Wo) -> (N, Cout, Ho, Wo); drop the lane padding first.
    out = out[:, :NM].reshape(Cout, N, Ho, Wo)
    return jnp.transpose(out, (1, 0, 2, 3))


def _reference_gated_conv2d(x, weight, bias, *, stride=1, padding=0):
    """Pure-JAX f32 reference (matches torch.nn.Conv2d + chunk + sigmoid gate)."""
    y = jax.lax.conv_general_dilated(
        x, weight,
        window_strides=(stride, stride),
        padding=[(padding, padding), (padding, padding)],
        dimension_numbers=("NCHW", "OIHW", "NCHW"))
    y = y + bias[None, :, None, None]
    Cout = weight.shape[0] // 2
    out, gate = y[:, :Cout], y[:, Cout:]
    return out * jax.nn.sigmoid(gate)


if __name__ == "__main__":
    # GatedConv2d(in_channels=4, out_channels=4, kernel_size=3, stride=1, padding=1)
    N, Cin, H, W = 2, 4, 16, 16
    Cout, Ksz, stride, padding = 4, 3, 1, 1

    key = jax.random.PRNGKey(0)
    kx, kw, kb = jax.random.split(key, 3)

    x = jax.random.normal(kx, (N, Cin, H, W), dtype=jnp.float32)
    fan_in = Cin * Ksz * Ksz
    weight = jax.random.uniform(kw, (2 * Cout, Cin, Ksz, Ksz), dtype=jnp.float32,
                                minval=-1.0, maxval=1.0) / jnp.sqrt(fan_in)
    bias = jax.random.uniform(kb, (2 * Cout,), dtype=jnp.float32,
                              minval=-0.1, maxval=0.1)

    # m_tile=256 -> two lane tiles (exercises the flattened N*M grid).
    run = jax.jit(functools.partial(gated_conv2d, stride=stride, padding=padding,
                                    m_tile=256))
    y = run(x, weight, bias)
    y = jax.block_until_ready(y)

    y_ref = _reference_gated_conv2d(x, weight, bias, stride=stride, padding=padding)
    assert y.shape == (N, Cout, H, W), y.shape
    # bf16 patches/weights with f32 accumulation + f32 gating: loosened tolerance.
    assert jnp.allclose(y, y_ref, atol=5e-2, rtol=5e-2), (
        "mismatch vs JAX reference; max abs diff = "
        f"{float(jnp.max(jnp.abs(y - y_ref)))}")

    print("KERNEL_OK")
</pallas_src>

<mosaic_0001>
module attributes {stable_mosaic.version = 11 : i64} {
  func.func @_gated_conv_kernel(%arg0: i32, %arg1: memref<36x256xbf16, #tpu.memory_space<vmem>>, %arg2: memref<4x36xbf16, #tpu.memory_space<vmem>>, %arg3: memref<4x36xbf16, #tpu.memory_space<vmem>>, %arg4: memref<4x1xf32, #tpu.memory_space<vmem>>, %arg5: memref<4x1xf32, #tpu.memory_space<vmem>>, %arg6: memref<4x256xf32, #tpu.memory_space<vmem>>) attributes {dimension_semantics = [#tpu.dimension_semantics<parallel>], iteration_bounds = array<i64: 2>, scalar_prefetch = 0 : i64, scratch_operands = 0 : i64, tpu.core_type = #tpu.core_type<tc>, window_params = [{transform_indices = @transform_0, window_bounds = array<i64: 36, 256>}, {pipeline_mode = #tpu.pipeline_mode<synchronous>, transform_indices = @transform_1, window_bounds = array<i64: 4, 36>}, {pipeline_mode = #tpu.pipeline_mode<synchronous>, transform_indices = @transform_2, window_bounds = array<i64: 4, 36>}, {pipeline_mode = #tpu.pipeline_mode<synchronous>, transform_indices = @transform_3, window_bounds = array<i64: 4, 1>}, {pipeline_mode = #tpu.pipeline_mode<synchronous>, transform_indices = @transform_4, window_bounds = array<i64: 4, 1>}, {transform_indices = @transform_5, window_bounds = array<i64: 4, 256>}]} {
    %c0 = arith.constant 0 : index
    %c0_0 = arith.constant 0 : index
    %0 = vector.load %arg1[%c0, %c0_0] : memref<36x256xbf16, #tpu.memory_space<vmem>>, vector<36x256xbf16>
    %c0_1 = arith.constant 0 : index
    %c0_2 = arith.constant 0 : index
    %1 = vector.load %arg2[%c0_1, %c0_2] : memref<4x36xbf16, #tpu.memory_space<vmem>>, vector<4x36xbf16>
    %cst = arith.constant dense<0.000000e+00> : vector<4x256xf32>
    %2 = tpu.matmul %1, %0, %cst {dimension_numbers = #tpu.dot_dimension_numbers<[1], [0], [0], [1], [0, 0, 1, 1], [], []>} : vector<4x36xbf16>, vector<36x256xbf16>, vector<4x256xf32> -> vector<4x256xf32>
    %c0_3 = arith.constant 0 : index
    %c0_4 = arith.constant 0 : index
    %3 = vector.load %arg4[%c0_3, %c0_4] : memref<4x1xf32, #tpu.memory_space<vmem>>, vector<4x1xf32>
    %4 = vector.broadcast %3 : vector<4x1xf32> to vector<4x256xf32>
    %5 = arith.addf %2, %4 : vector<4x256xf32>
    %c0_5 = arith.constant 0 : index
    %c0_6 = arith.constant 0 : index
    %6 = vector.load %arg3[%c0_5, %c0_6] : memref<4x36xbf16, #tpu.memory_space<vmem>>, vector<4x36xbf16>
    %cst_7 = arith.constant dense<0.000000e+00> : vector<4x256xf32>
    %7 = tpu.matmul %6, %0, %cst_7 {dimension_numbers = #tpu.dot_dimension_numbers<[1], [0], [0], [1], [0, 0, 1, 1], [], []>} : vector<4x36xbf16>, vector<36x256xbf16>, vector<4x256xf32> -> vector<4x256xf32>
    %c0_8 = arith.constant 0 : index
    %c0_9 = arith.constant 0 : index
    %8 = vector.load %arg5[%c0_8, %c0_9] : memref<4x1xf32, #tpu.memory_space<vmem>>, vector<4x1xf32>
    %9 = vector.broadcast %8 : vector<4x1xf32> to vector<4x256xf32>
    %10 = arith.addf %7, %9 : vector<4x256xf32>
    %11 = arith.negf %10 : vector<4x256xf32>
    %12 = math.exp %11 : vector<4x256xf32>
    %cst_10 = arith.constant 1.000000e+00 : f32
    %13 = vector.broadcast %cst_10 : f32 to vector<4x256xf32>
    %14 = arith.addf %13, %12 : vector<4x256xf32>
    %15 = arith.divf %13, %14 : vector<4x256xf32>
    %16 = arith.mulf %5, %15 : vector<4x256xf32>
    %c0_11 = arith.constant 0 : index
    %c0_12 = arith.constant 0 : index
    %17 = vector.load %arg6[%c0_11, %c0_12] : memref<4x256xf32, #tpu.memory_space<vmem>>, vector<4x256xf32>
    tpu.vector_store %arg6[%c0_11, %c0_12], %16 {strides = array<i32>} : memref<4x256xf32, #tpu.memory_space<vmem>>, vector<4x256xf32>,
    return
  }
  func.func @transform_0(%arg0: i32) -> (i32, i32) {
    %c0_i32 = arith.constant 0 : i32
    %c0_i32_0 = arith.constant 0 : i32
    return %c0_i32, %arg0 : i32, i32
  }
  func.func @transform_1(%arg0: i32) -> (i32, i32) {
    %c0_i32 = arith.constant 0 : i32
    %c0_i32_0 = arith.constant 0 : i32
    %c0_i32_1 = arith.constant 0 : i32
    return %c0_i32, %c0_i32_0 : i32, i32
  }
  func.func @transform_2(%arg0: i32) -> (i32, i32) {
    %c0_i32 = arith.constant 0 : i32
    %c0_i32_0 = arith.constant 0 : i32
    %c0_i32_1 = arith.constant 0 : i32
    return %c0_i32, %c0_i32_0 : i32, i32
  }
  func.func @transform_3(%arg0: i32) -> (i32, i32) {
    %c0_i32 = arith.constant 0 : i32
    %c0_i32_0 = arith.constant 0 : i32
    %c0_i32_1 = arith.constant 0 : i32
    return %c0_i32, %c0_i32_0 : i32, i32
  }
  func.func @transform_4(%arg0: i32) -> (i32, i32) {
    %c0_i32 = arith.constant 0 : i32
    %c0_i32_0 = arith.constant 0 : i32
    %c0_i32_1 = arith.constant 0 : i32
    return %c0_i32, %c0_i32_0 : i32, i32
  }
  func.func @transform_5(%arg0: i32) -> (i32, i32) {
    %c0_i32 = arith.constant 0 : i32
    %c0_i32_0 = arith.constant 0 : i32
    return %c0_i32, %arg0 : i32, i32
  }
}

</mosaic_0001>

<bundles_post_ra>
// kernel: gated_conv2d.1
= control target key start
LH: loop header
LB: loop body
LE: loop exit
PB: predicated region body
PF: predicated region fallthrough
CT: control target
= control target key end

     0   :  { %s623_s18 = smov 0   ;;  %s625_s19 = smov 0   ;;  %s687_s0 = inlined_call_operand.vmem [shape: bf16[36,512], index: 0, kind: input, shape index: {}]   ;;  %s688_s1 = inlined_call_operand.vmem [shape: bf16[4,36], index: 1, kind: input, shape index: {}]   ;;  %s689_s2 = inlined_call_operand.vmem [shape: bf16[4,36], index: 2, kind: input, shape index: {}]   ;;  %s690_s3 = inlined_call_operand.vmem [shape: f32[4,1], index: 3, kind: input, shape index: {}]   ;;  %s691_s4 = inlined_call_operand.vmem [shape: f32[4,1], index: 4, kind: input, shape index: {}]   ;;  %s692_s5 = inlined_call_operand.vmem [shape: f32[4,512], index: 5, kind: output, shape index: {}]  }
   0x1   :  { %s627_s20 = smov 0  }
   0x2 LB: > { %s500_s21 = sadd.s32 4294967295, %s590_s20   ;;  %s640_s22 = sadd.s32 1, %s590_s20   ;;  %s590_s20 = sphi %s627_s20, %s695_s20   ;;  %s586_s19 = sphi %s625_s19, %s694_s19   ;;  %s582_s18 = sphi %s623_s18, %s693_s18  }
   0x3   : > { %s19_s23 = ssub.s32 %s590_s20, %s640_s22  ;;  %s22_s24 = sadd.s32 1, %s586_s19 }
   0x4   : > { %p20_p0 = scmp.eq.s32.totalorder %s19_s23, 0  ;;  %p29_p1 = scmp.ne.s32.totalorder %s586_s19, %s582_s18 }
   0x5   : > { %p30_p2 = scmp.eq.s32.totalorder %s590_s20, 0  ;;  %p503_p4 = scmp.ge.s32.totalorder %s590_s20, 2 }
   0x6   : > { %s649_s25 = scalar_select %p20_p0, %s586_s19, %s22_s24  }
   0x7   : > { %p31_p3 = por %p30_p2, %p29_p1  ;;  %177 = sbr.rel (%p503_p4) target bundleno = 21 (0x15), region = 32 }
   0xe   : > { %180 = sbr.rel (!%p31_p3) target bundleno = 21 (0x15), region = 36  ;;  %s182_s26 = sand.u32 (%p31_p3), 1, %s586_s19  }
   0xf   : > { %s523_s27 = sshll.u32 (%p31_p3), %s590_s20, 3  ;;  %s524_s28 = smul.u32 (%p31_p3), 40, %s182_s26 }
  0x10   : > { %s187_s6 = scalar_lea.vmem (%p31_p3), %s687_s0, %s523_s27 }
  0x11   : > { %v223_v0 = vld [vmem:[%s187_s6] sm:$0xff] (%p31_p3)  ;;  %v225_v1 = vld [vmem:[%s187_s6 + $0x10] sm:$0xff] (%p31_p3)  ;;  %s184_s7 = scalar_lea.vmem (%p31_p3), [#allocation2], %s524_s28 }
  0x12   : > { %v227_v2 = vld [vmem:[%s187_s6 + $0x20] sm:$0xff] (%p31_p3)  ;;  %v229_v3 = vld [vmem:[%s187_s6 + $0x30] sm:$0xff] (%p31_p3)  ;;  %224 = vst [vmem:[%s184_s7] sm:$0xff] (%p31_p3), %v223_v0  ;;  %226 = vst [vmem:[%s184_s7 + $0x8] sm:$0xff] (%p31_p3), %v225_v1 }
  0x13   : > { %v231_v4 = vld [vmem:[%s187_s6 + $0x40] sm:$0xff] (%p31_p3)  ;;  %228 = vst [vmem:[%s184_s7 + $0x10] sm:$0xff] (%p31_p3), %v227_v2  ;;  %230 = vst [vmem:[%s184_s7 + $0x18] sm:$0xff] (%p31_p3), %v229_v3 }
  0x14   : > { %232 = vst [vmem:[%s184_s7 + $0x20] sm:$0xff] (%p31_p3), %v231_v4 }
  0x15 PF: > { %p506_p5 = scmp.ge.s32.totalorder %s590_s20, 1  ;;  %p237_p6 = scmp.lt.s32.totalorder %s590_s20, 3 }
  0x17   : > { %p238_p7 = pnand %p506_p5, %p237_p6 }
  0x18   : > { %s244_s8 = sand.u32 (!%p238_p7), 1, %s582_s18   ;;  %v592_v5 = vmov (!%p238_p7), 0   ;;  %v369_v6 = vld [vmem:[%s691_s4] sm:$0xf] (!%p238_p7)  ;;  %vm320_vm0 = vcmask (!%p238_p7), 1041408   ;;  %vm316_vm1 = vcmask (!%p238_p7), 293888  }
  0x19   : > { %241 = sbr.rel (%p238_p7) target bundleno = 288 (0x120), region = 74  ;;  %359 = vmatprep.mubr.bf16.mxu0 (!%p238_p7), %v592_v5  ;;  %410 = vmatprep.mubr.bf16.mxu1 (!%p238_p7), %v592_v5  ;;  %v285_v11 = vld [vmem:[%s690_s3] sm:$0xf] (!%p238_p7)  ;;  %s507_s23 = sshll.u32 (!%p238_p7), %s500_s21, 1 }
  0x1a   : > { %s525_s9 = smul.u32 (!%p238_p7), 40, %s244_s8  ;;  %551 = vset.pattern.permute.xlu0 (!%p238_p7), %v592_v5  ;;  %v284_v16 = vld [vmem:[%s688_s1] sm:$0x3] (!%p238_p7)  ;;  %p273_p8 = scmp.lt.s32.totalorder (!%p238_p7), %s507_s23, 3 }
  0x1b   : > { %372 = vperm.xlu0 (!%p238_p7), %551, %v369_v6   ;;  %v368_v17 = vld [vmem:[%s689_s2] sm:$0x3] (!%p238_p7) }
  0x1c   : > { %s246_s12 = scalar_lea.vmem (!%p238_p7), [#allocation2], %s525_s9 }
  0x1d   : > { %v552_v7 = vld [vmem:[%s246_s12 + $0x4] ss:$8 sps:$4 sm:$0xff] (!%p238_p7)   ;;  %v554_v8 = vld [vmem:[%s246_s12] ss:$8 sps:$4 sm:$0xff] (!%p238_p7)   ;;  %v555_v9 = vld [vmem:[%s246_s12 + $0x14] ss:$8 sps:$4 sm:$0xff] (!%p238_p7)  }
  0x1e   : > { %327 = vmatprep.subr.bf16.mxu0 (!%p238_p7), %v552_v7  ;;  %378 = vmatprep.subr.bf16.mxu1 (!%p238_p7), %v552_v7  ;;  %v283_v10 = vld [vmem:[%s246_s12 + $0x20] sm:$0x33] (!%p238_p7)  ;;  %v557_v12 = vld [vmem:[%s246_s12 + $0x10] ss:$8 sps:$4 sm:$0xff] (!%p238_p7)  }
  0x1f   : > { %328 = vmatpush1.bf16.msra.mxu0 (!%p238_p7), %v554_v8  ;;  %379 = vmatpush1.bf16.msra.mxu1 (!%p238_p7), %v554_v8  ;;  %v514_v13 = vcombine.high (!%p238_p7), %v283_v10, %v283_v10  ;;  %v513_v14 = vcombine.low (!%p238_p7), %v283_v10, %v283_v10 }
  0x20   : > { %329 = vmatprep.subr.bf16.mxu0 %v555_v9  ;;  %380 = vmatprep.subr.bf16.mxu1 %v555_v9  ;;  %s697_s23 = smov (!%p273_p8, %s507_s23), 3 }
  0x21   : > { %288 = vperm.xlu0 %551, %v285_v11   ;;  %v322_v15 = vsel %vm320_vm0, %v513_v14, 0  ;;  %s508_s24 = sshll.u32 %s697_s23, 2 }
  0x22   : > { %s276_s28 = scalar_lea.vmem %s692_s5, %s508_s24 }
  0x23   : > { %330 = vmatpush1.bf16.msra.mxu0 %v557_v12  ;;  %381 = vmatpush1.bf16.msra.mxu1 %v557_v12 }
  0x24   : > { %515 = vmatprep.subr.msk.bf16.mxu0 %vm320_vm0, %v514_v13  ;;  %517 = vmatprep.subr.msk.bf16.mxu1 %vm320_vm0, %v514_v13 }
  0x27   : > { %332 = vmatpush1.bf16.msra.mxu0 %v322_v15  ;;  %383 = vmatpush1.bf16.msra.mxu1 %v322_v15 }
  0x2a   : > { %516 = vmatmul.mubr.msk.bf16.vlgmr.msra.gmra.mrb[0].mxu0 %vm316_vm1, %v284_v16  ;;  %518 = vmatmul.mubr.msk.bf16.vlgmr.msra.gmra.mrb[0].mxu1 %vm316_vm1, %v368_v17 }
  0x9a   : > { %v373_v18 = vpop.permute.xlu0 %372 }
  0xa0   : > { %v289_v35 = vpop.permute.xlu0 %288 }
  0xfd   : > { %v361_v19 = vpop.f32.mrb[0].mxu0  ;;  %v412_v20 = vpop.f32.mrb[0].mxu1 }
  0xfe   : > { %v413_v21 = vadd.f32 %v412_v20, %v373_v18  ;;  %v363_v22 = vpop.f32.mrb[1].mxu0  ;;  %v414_v23 = vpop.f32.mrb[1].mxu1  ;;  %v362_v36 = vadd.f32 %v361_v19, %v289_v35 }
  0xff   : > { %v415_v24 = vadd.f32 %v414_v23, %v373_v18  ;;  %v416_v25 = vpop.f32.mrb[2].mxu1  ;;  %v365_v26 = vpop.f32.mrb[2].mxu0  ;;  %v364_v38 = vadd.f32 %v363_v22, %v289_v35 }
 0x100   : > { %v519_v27 = vmul.f32 -1.442695, %v413_v21  ;;  %v417_v28 = vpop.f32.mrb[3].mxu1  ;;  %v366_v29 = vpop.f32.mrb[3].mxu0 }
 0x101   : > { %v520_v30 = vmul.f32 -1.442695, %v415_v24 }
 0x102   : > { %560 = vpow2.f32 %v519_v27 }
 0x103   : > { %562 = vpow2.f32 %v520_v30 }
 0x10c   : > { %v561_v31 = vpop.eup %560 }
 0x10d   : > { %v563_v32 = vpop.eup %562  ;;  %v425_v33 = vadd.f32 1.0, %v561_v31 }
 0x10e   : > { %v426_v34 = vadd.f32 1.0, %v563_v32 }
 0x10f   : > { %564 = vrcp.f32 %v425_v33 }
 0x110   : > { %566 = vrcp.f32 %v426_v34 }
 0x119   : > { %v565_v37 = vpop.eup %564 }
 0x11a   : > { %v567_v39 = vpop.eup %566  ;;  %v431_v40 = vmul.f32 %v565_v37, %v362_v36 }
 0x11b   : > { %v432_v41 = vmul.f32 %v567_v39, %v364_v38 }
 0x11d   : > { %v435_v42 = vcombine.low %v431_v40, %v432_v41 }
 0x11f   : > { %437 = vst [vmem:[%s276_s28] sm:$0xff] %v435_v42 }
 0x120 PF: > { %p12_p9 = scmp.ge.s32.totalorder %s640_s22, 4   ;;  %s693_s18 = smov %s586_s19 }
 0x121   : > { %s694_s19 = smov %s649_s25  ;;  %s695_s20 = smov %s640_s22 }
 0x122   :  { %14 = sbr.rel (!%p12_p9) target bundleno = 2 (0x2), region = 113 }

</bundles_post_ra>
